<compile_context>
chip_gen: v7x
topology: tpu7x:2x2x1
jax: 0.10.0
libtpu: 0.0.40
codegen_flags: <defaults>
</compile_context>

<pallas_src>
import functools
import math

import jax
import jax.numpy as jnp
from jax import lax
from jax.experimental import pallas as pl
from jax.experimental.pallas import tpu as pltpu

# MXU fast path (bf16 operands, f32 accumulation).  Set to jnp.float32 for
# bit-tighter numerics; at these shapes the kernel is memory-bound either way.
MATMUL_DTYPE = jnp.bfloat16


# ----------------------------------------------------------------------------
# Pallas kernel: one grid step processes `nb` images.
#   bank_ref    : (O, KKp)       zero-mean Gabor taps + bias column (+ zero pad)
#   patches_ref : (nb, KKp, HW)  im2col taps + ones row (+ zero pad), lane-dense
#   out_ref     : (nb, O, HW)    N-major output, lane-dense (HW) stores
# ----------------------------------------------------------------------------
def _gabor_conv_kernel(bank_ref, patches_ref, out_ref, *, nb):
    bank = bank_ref[...]                                   # (O, KKp)
    for b in range(nb):                                    # tiny static unroll
        acc = jnp.dot(bank, patches_ref[b],                # (O,KKp)@(KKp,HW) on MXU
                      preferred_element_type=jnp.float32)
        out_ref[b] = acc.astype(out_ref.dtype)


# ----------------------------------------------------------------------------
# Parameter init — mirrors TrainableGaborConv2d.__init__ deterministically.
# ----------------------------------------------------------------------------
def init_gabor_params(in_channels, out_channels, kernel_size, key):
    k = kernel_size if isinstance(kernel_size, tuple) else (kernel_size, kernel_size)
    O = out_channels
    thetas = jnp.linspace(0.0, math.pi - math.pi / O, O, dtype=jnp.float32)
    freq_list = [0.15, 0.3] * (O // 2) + ([0.2] if O % 2 else [])
    frequencies = jnp.array(freq_list, dtype=jnp.float32)
    sigmas = jnp.full((O,), k[0] / 4.5, dtype=jnp.float32)
    psis = jnp.zeros((O,), dtype=jnp.float32)
    xg = jnp.linspace(-(k[0] - 1) / 2.0, (k[0] - 1) / 2.0, k[0], dtype=jnp.float32)
    yg = jnp.linspace(-(k[1] - 1) / 2.0, (k[1] - 1) / 2.0, k[1], dtype=jnp.float32)
    grid_x = jnp.tile(xg[None, :], (k[1], 1))             # (k1, k0) — as torch .repeat
    grid_y = jnp.tile(yg[:, None], (1, k[0]))             # (k1, k0)
    bound = 1.0 / math.sqrt(in_channels * k[0] * k[1])
    bias = jax.random.uniform(key, (O,), jnp.float32, minval=-bound, maxval=bound)
    return dict(thetas=thetas, frequencies=frequencies, sigmas=sigmas, psis=psis,
                grid_x=grid_x, grid_y=grid_y, bias=bias)


def _gabor_bank(p):
    """Zero-mean Gabor bank (O, kH, kW), tiny f32 math done in plain JAX
    (fuses into surrounding XLA; avoids an extra kernel launch)."""
    gx, gy = p["grid_x"], p["grid_y"]
    th = p["thetas"][:, None, None]
    fr = p["frequencies"][:, None, None]
    sg = p["sigmas"][:, None, None]
    ps = p["psis"][:, None, None]
    rot_x = gx[None] * jnp.cos(th) + gy[None] * jnp.sin(th)
    rot_y = -gx[None] * jnp.sin(th) + gy[None] * jnp.cos(th)
    g = jnp.exp(-0.5 * (rot_x ** 2 + rot_y ** 2) / sg ** 2) \
        * jnp.cos(2.0 * math.pi * fr * rot_x + ps)
    return g - g.mean(axis=(1, 2), keepdims=True)


# ----------------------------------------------------------------------------
# Generation-aware tiling helpers.
# ----------------------------------------------------------------------------
def _num_tensorcores():
    # v7x has 2 TensorCores per chip; v5e/v6e have 1.
    try:
        kind = jax.devices()[0].device_kind.lower()
    except Exception:
        return 1
    return 2 if ("v7" in kind or "7x" in kind or "tpu7" in kind) else 1


def _vmem_budget_bytes():
    # Use ~1/4 of physical VMEM as a conservative per-step budget
    # (stays inside the scoped default on v5e/v6e/v7x).
    try:
        return int(pltpu.get_tpu_info().vmem_capacity_bytes) // 4
    except Exception:
        return 16 << 20


def _pick_block_batch(N, bytes_per_image, n_cores, vmem_budget, max_nb=32):
    """Images per grid step: largest divisor of N that fits the VMEM budget,
    preferring >= n_cores grid steps (so both v7x TensorCores get work);
    single-TC chips take one fat step to amortize per-step overhead."""
    divisors = [d for d in range(N, 0, -1) if N % d == 0]
    fit = [d for d in divisors
           if d * bytes_per_image <= vmem_budget and d <= max_nb] or [1]
    pref = [d for d in fit if N // d >= n_cores]
    return pref[0] if pref else fit[0]


# ----------------------------------------------------------------------------
# Forward wrapper.
# ----------------------------------------------------------------------------
def gabor_conv2d(x, p, *, stride=1, padding=0):
    N, C, H, W = x.shape
    assert C == 1, "torch module builds weight with in-channel dim 1 -> requires C==1"
    O = p["thetas"].shape[0]
    kH, kW = p["grid_x"].shape
    KK = kH * kW

    Ho = (H + 2 * padding - kH) // stride + 1
    Wo = (W + 2 * padding - kW) // stride + 1
    HW = Ho * Wo

    # ---- Gabor bank + bias folded into one sublane-aligned matmul operand ---
    bank = _gabor_bank(p).reshape(O, KK)                              # (O, 25) f32
    bank_ext = jnp.concatenate(
        [bank, p["bias"].reshape(O, 1).astype(jnp.float32)], axis=1)  # (O, 26)
    KKe = KK + 1                              # taps + ones row (bias fold)
    KKp = ((KKe + 15) // 16) * 16             # 25(+1) -> 32: unmasked MXU feed
    bank_pad = jnp.pad(bank_ext, ((0, 0), (0, KKp - KKe))).astype(MATMUL_DTYPE)

    # ---- wrapper-side im2col -> lane-dense (N, KKp, Ho*Wo) patches ----------
    # (stride/padding handled by XLA here; the kernel sees only dense tiles)
    patches = lax.conv_general_dilated_patches(
        x.astype(jnp.float32),
        filter_shape=(kH, kW),
        window_strides=(stride, stride),
        padding=[(padding, padding), (padding, padding)],
        dimension_numbers=("NCHW", "OIHW", "NCHW"),
        precision=lax.Precision.HIGHEST,
    ).reshape(N, KK, HW)                                              # C == 1
    ones = jnp.ones((N, 1, HW), jnp.float32)
    patches_ext = jnp.concatenate([patches, ones], axis=1)            # (N, 26, HW)
    patches_pad = jnp.pad(
        patches_ext, ((0, 0), (0, KKp - KKe), (0, 0))).astype(MATMUL_DTYPE)

    # ---- generation-aware batch tiling ---------------------------------------
    bytes_per_image = (2 * KKp * HW * patches_pad.dtype.itemsize      # dbl-buffered in
                       + 2 * O * HW * 4)                              # dbl-buffered out (f32)
    Nb = _pick_block_batch(N, bytes_per_image, _num_tensorcores(), _vmem_budget_bytes())
    grid = (N // Nb,)

    kernel = functools.partial(_gabor_conv_kernel, nb=Nb)
    out_flat = pl.pallas_call(
        kernel,
        out_shape=jax.ShapeDtypeStruct((N, O, HW), jnp.float32),
        grid=grid,
        in_specs=[
            pl.BlockSpec((O, KKp), lambda n: (0, 0)),            # bank(+bias), grid-invariant
            pl.BlockSpec((Nb, KKp, HW), lambda n: (n, 0, 0)),    # Nb images of patches
        ],
        out_specs=pl.BlockSpec((Nb, O, HW), lambda n: (n, 0, 0)),  # N-major, lane-dense
        compiler_params=pltpu.CompilerParams(
            dimension_semantics=("parallel",)),
    )(bank_pad, patches_pad)

    # Free reshape only (no transpose / extra HBM pass): (N, O, HW) -> NCHW.
    return out_flat.reshape(N, O, Ho, Wo).astype(x.dtype)


# ----------------------------------------------------------------------------
# Pure-JAX reference (mirrors the torch forward) for validation.
# ----------------------------------------------------------------------------
def gabor_conv2d_ref(x, p, *, stride=1, padding=0):
    g = _gabor_bank(p)
    weight = g[:, None, :, :]                              # (O, 1, kH, kW)
    out = lax.conv_general_dilated(
        x, weight, window_strides=(stride, stride),
        padding=[(padding, padding), (padding, padding)],
        dimension_numbers=("NCHW", "OIHW", "NCHW"),
        precision=lax.Precision.HIGHEST)
    return out + p["bias"][None, :, None, None]


if __name__ == "__main__":
    key = jax.random.PRNGKey(0)
    k_bias, k_x = jax.random.split(key)

    in_channels, out_channels, kernel_size = 1, 8, 5
    stride, padding = 1, 2
    N, H, W = 2, 16, 16

    params = init_gabor_params(in_channels, out_channels, kernel_size, k_bias)
    x = jax.random.normal(k_x, (N, in_channels, H, W), dtype=jnp.float32)

    out = jax.block_until_ready(gabor_conv2d(x, params, stride=stride, padding=padding))
    ref = jax.block_until_ready(gabor_conv2d_ref(x, params, stride=stride, padding=padding))

    assert out.shape == ref.shape == (N, out_channels, H, W)
    # bf16 matmul operands (f32 accumulation) vs. f32 reference -> relaxed tol.
    tol = 3e-2 if MATMUL_DTYPE == jnp.bfloat16 else 1e-3
    err = float(jnp.max(jnp.abs(out - ref)))
    assert jnp.allclose(out, ref, atol=tol, rtol=tol), f"max err = {err}"

    print("KERNEL_OK")
</pallas_src>

<mosaic_0001>
module attributes {stable_mosaic.version = 11 : i64} {
  func.func @_gabor_conv_kernel(%arg0: i32, %arg1: memref<8x32xbf16, #tpu.memory_space<vmem>>, %arg2: memref<2x32x256xbf16, #tpu.memory_space<vmem>>, %arg3: memref<2x8x256xf32, #tpu.memory_space<vmem>>) attributes {dimension_semantics = [#tpu.dimension_semantics<parallel>], iteration_bounds = array<i64: 1>, scalar_prefetch = 0 : i64, scratch_operands = 0 : i64, tpu.core_type = #tpu.core_type<tc>, window_params = [{pipeline_mode = #tpu.pipeline_mode<synchronous>, transform_indices = @transform_0, window_bounds = array<i64: 8, 32>}, {transform_indices = @transform_1, window_bounds = array<i64: 2, 32, 256>}, {transform_indices = @transform_2, window_bounds = array<i64: 2, 8, 256>}]} {
    %c0 = arith.constant 0 : index
    %c0_0 = arith.constant 0 : index
    %0 = vector.load %arg1[%c0, %c0_0] : memref<8x32xbf16, #tpu.memory_space<vmem>>, vector<8x32xbf16>
    %c0_1 = arith.constant 0 : index
    %c0_2 = arith.constant 0 : index
    %c0_3 = arith.constant 0 : index
    %1 = vector.load %arg2[%c0_1, %c0_2, %c0_3] : memref<2x32x256xbf16, #tpu.memory_space<vmem>>, vector<1x32x256xbf16>
    %2 = vector.shape_cast %1 : vector<1x32x256xbf16> to vector<32x256xbf16>
    %cst = arith.constant dense<0.000000e+00> : vector<8x256xf32>
    %3 = tpu.matmul %0, %2, %cst {dimension_numbers = #tpu.dot_dimension_numbers<[1], [0], [0], [1], [0, 0, 1, 1], [], []>} : vector<8x32xbf16>, vector<32x256xbf16>, vector<8x256xf32> -> vector<8x256xf32>
    %c0_4 = arith.constant 0 : index
    %c0_5 = arith.constant 0 : index
    %c0_6 = arith.constant 0 : index
    %4 = vector.load %arg3[%c0_4, %c0_5, %c0_6] : memref<2x8x256xf32, #tpu.memory_space<vmem>>, vector<1x8x256xf32>
    %5 = vector.shape_cast %4 : vector<1x8x256xf32> to vector<8x256xf32>
    %6 = vector.shape_cast %3 : vector<8x256xf32> to vector<1x8x256xf32>
    tpu.vector_store %arg3[%c0_4, %c0_5, %c0_6], %6 {strides = array<i32>} : memref<2x8x256xf32, #tpu.memory_space<vmem>>, vector<1x8x256xf32>,
    %c1 = arith.constant 1 : index
    %c0_7 = arith.constant 0 : index
    %c0_8 = arith.constant 0 : index
    %7 = vector.load %arg2[%c1, %c0_7, %c0_8] : memref<2x32x256xbf16, #tpu.memory_space<vmem>>, vector<1x32x256xbf16>
    %8 = vector.shape_cast %7 : vector<1x32x256xbf16> to vector<32x256xbf16>
    %cst_9 = arith.constant dense<0.000000e+00> : vector<8x256xf32>
    %9 = tpu.matmul %0, %8, %cst_9 {dimension_numbers = #tpu.dot_dimension_numbers<[1], [0], [0], [1], [0, 0, 1, 1], [], []>} : vector<8x32xbf16>, vector<32x256xbf16>, vector<8x256xf32> -> vector<8x256xf32>
    %c1_10 = arith.constant 1 : index
    %c0_11 = arith.constant 0 : index
    %c0_12 = arith.constant 0 : index
    %10 = vector.load %arg3[%c1_10, %c0_11, %c0_12] : memref<2x8x256xf32, #tpu.memory_space<vmem>>, vector<1x8x256xf32>
    %11 = vector.shape_cast %10 : vector<1x8x256xf32> to vector<8x256xf32>
    %12 = vector.shape_cast %9 : vector<8x256xf32> to vector<1x8x256xf32>
    tpu.vector_store %arg3[%c1_10, %c0_11, %c0_12], %12 {strides = array<i32>} : memref<2x8x256xf32, #tpu.memory_space<vmem>>, vector<1x8x256xf32>,
    return
  }
  func.func @transform_0(%arg0: i32) -> (i32, i32) {
    %c0_i32 = arith.constant 0 : i32
    %c0_i32_0 = arith.constant 0 : i32
    %c0_i32_1 = arith.constant 0 : i32
    return %c0_i32, %c0_i32_0 : i32, i32
  }
  func.func @transform_1(%arg0: i32) -> (i32, i32, i32) {
    %c0_i32 = arith.constant 0 : i32
    %c0_i32_0 = arith.constant 0 : i32
    %c0_i32_1 = arith.constant 0 : i32
    return %arg0, %c0_i32, %c0_i32_0 : i32, i32, i32
  }
  func.func @transform_2(%arg0: i32) -> (i32, i32, i32) {
    %c0_i32 = arith.constant 0 : i32
    %c0_i32_0 = arith.constant 0 : i32
    %c0_i32_1 = arith.constant 0 : i32
    return %arg0, %c0_i32, %c0_i32_0 : i32, i32, i32
  }
}

</mosaic_0001>

<bundles_post_ra>
// kernel: tpu_custom_call.1
= control target key start
LH: loop header
LB: loop body
LE: loop exit
PB: predicated region body
PF: predicated region fallthrough
CT: control target
= control target key end

     0   :  { %7 = vsyncpa [#allocation3], 0  ;;  %s373_s0 = inlined_call_operand.hbm [shape: bf16[8,32], index: 0, kind: input, shape index: {}]   ;;  %s374_s1 = inlined_call_operand.hbm [shape: bf16[2,32,256], index: 1, kind: input, shape index: {}]   ;;  %s375_s2 = inlined_call_operand.hbm [shape: f32[2,8,256], index: 2, kind: output, shape index: {}]  }
   0x1   :  { %8 = vsyncpa [#allocation6], 0 }
   0x2   :  { %9 = vsyncpa [#allocation4], 0  ;;  %s300_s9 = smov [#allocation2]   ;;  %s301_s11 = smov [#allocation5]  }
   0x3   :  { %s16_s10 = sshll.u32 %s300_s9, 4  ;;  %s25_s12 = sshll.u32 %s301_s11, 4  ;;  %s17_s10 = int_to_ptr.vmem [resolvable:$true] %s16_s10  ;;  %s323_s12 = int_to_ptr.vmem [resolvable:$true] %s25_s12 }
   0x4   :  { %s228_s15 = scalar_lea.hbm %s373_s0, 64 }
   0x5   :  { %p229_p0 = scmp.ne.s32.totalorder %s373_s0, %s228_s15  ;;  %p232_p1 = scmp.lt.u32.totalorder %s228_s15, %s373_s0 }
   0x7   :  { %p234_p2 = pnand %p232_p1, %p229_p0 }
   0x9   :  { %237 = shalt.err (!%p234_p2)
}
   0xa   :  { %s238_s20 = scalar_lea.vmem %s17_s10, 64  ;;  %p243_p4 = scmp.lt.s32.totalorder %s17_s10, %s17_s10 }
   0xb   :  { %p239_p3 = scmp.ne.s32.totalorder %s17_s10, %s238_s20  ;;  %p244_p5 = scmp.lt.s32.totalorder %s238_s20, %s238_s20 }
   0xd   :  { %p245_p6 = por %p244_p5, %p243_p4 }
   0xf   :  { %p246_p7 = pnand %p245_p6, %p239_p3 }
  0x11   :  { %249 = shalt.err (!%p246_p7)
}
  0x12   :  { %19 = dma.hbm_to_vmem [thread:$0]  %s373_s0, 64, %s17_s10, [#allocation3]  }
  0x13   :  { %s250_s25 = scalar_lea.hbm %s374_s1, 1024 }
  0x14   :  { %p251_p8 = scmp.ne.s32.totalorder %s374_s1, %s250_s25  ;;  %p254_p9 = scmp.lt.u32.totalorder %s250_s25, %s374_s1 }
  0x16   :  { %p256_p10 = pnand %p254_p9, %p251_p8 }
  0x18   :  { %259 = shalt.err (!%p256_p10)
}
  0x19   :  { %s260_s30 = scalar_lea.vmem %s323_s12, 1024  ;;  %p265_p12 = scmp.lt.s32.totalorder %s323_s12, %s323_s12 }
  0x1a   :  { %p261_p11 = scmp.ne.s32.totalorder %s323_s12, %s260_s30  ;;  %p266_p13 = scmp.lt.s32.totalorder %s260_s30, %s260_s30 }
  0x1c   :  { %p267_p0 = por %p266_p13, %p265_p12 }
  0x1e   :  { %p268_p1 = pnand %p267_p0, %p261_p11 }
  0x20   :  { %271 = shalt.err (!%p268_p1)
}
  0x21   :  { %s302_s0 = smov 128   ;;  %s303_s3 = smov 8  }
  0x22   :  { %31 = dma.hbm_to_vmem [thread:$0]  %s374_s1, 1024, %s323_s12, [#allocation6], %s302_s0, %s302_s0, %s303_s3  }
  0x23   :  { %294 = dma.done.wait [#allocation3], 64  }
  0x24   :  { %295 = vsyncadd [#allocation3], 4294967232 }
  0x25   :  { %296 = dma.done.wait [#allocation6], 1024  }
  0x26   :  { %297 = vsyncadd [#allocation6], 4294966272  ;;  %v304_v0 = vmov 0   ;;  %v216_v1 = vld [vmem:[#allocation5 + $0x4] ss:$8 sps:$4 sm:$0xff]   ;;  %vm64_vm0 = vcmask 261120  }
  0x27   :  { %100 = vmatprep.mubr.bf16.mxu0 %v304_v0  ;;  %168 = vmatprep.mubr.bf16.mxu1 %v304_v0  ;;  %v218_v2 = vld [vmem:[#allocation5 + $0x24] ss:$8 sps:$4 sm:$0xff]   ;;  %v220_v3 = vld [vmem:[#allocation5] ss:$8 sps:$4 sm:$0xff]   ;;  %v222_v5 = vld [vmem:[#allocation5 + $0x14] ss:$8 sps:$4 sm:$0xff]  }
  0x28   :  { %68 = vmatprep.subr.bf16.mxu0 %v216_v1  ;;  %v221_v4 = vld [vmem:[#allocation5 + $0x20] ss:$8 sps:$4 sm:$0xff]   ;;  %136 = vmatprep.subr.bf16.mxu1 %v218_v2  ;;  %v224_v6 = vld [vmem:[#allocation5 + $0x34] ss:$8 sps:$4 sm:$0xff]   ;;  %v226_v7 = vld [vmem:[#allocation5 + $0x10] ss:$8 sps:$4 sm:$0xff]  }
  0x29   :  { %69 = vmatpush1.bf16.msra.mxu0 %v220_v3  ;;  %137 = vmatpush1.bf16.msra.mxu1 %v221_v4  ;;  %v227_v8 = vld [vmem:[#allocation5 + $0x30] ss:$8 sps:$4 sm:$0xff]   ;;  %v39_v9 = vld [vmem:[#allocation2] sm:$0xf]  ;;  %s305_s1 = smov [#allocation7]  }
  0x2a   :  { %70 = vmatprep.subr.bf16.mxu0 %v222_v5  ;;  %138 = vmatprep.subr.bf16.mxu1 %v224_v6  ;;  %s185_s6 = sshll.u32 %s305_s1, 4  ;;  %s354_s6 = int_to_ptr.vmem [resolvable:$true] %s185_s6 }
  0x2b   :  { %s272_s7 = scalar_lea.vmem %s354_s6, 512  ;;  %p277_p3 = scmp.lt.s32.totalorder %s354_s6, %s354_s6 }
  0x2c   :  { %p273_p2 = scmp.ne.s32.totalorder %s354_s6, %s272_s7  ;;  %p278_p4 = scmp.lt.s32.totalorder %s272_s7, %s272_s7 }
  0x2d   :  { %71 = vmatpush1.bf16.msra.mxu0 %v226_v7  ;;  %139 = vmatpush1.bf16.msra.mxu1 %v227_v8 }
  0x2e   :  { %p279_p5 = por %p278_p4, %p277_p3 }
  0x30   :  { %202 = vmatmul.mubr.msk.bf16.vlgmr.msra.gmra.mrb[0].mxu0 %vm64_vm0, %v39_v9  ;;  %207 = vmatmul.mubr.msk.bf16.vlgmr.msra.gmra.mrb[0].mxu1 %vm64_vm0, %v39_v9  ;;  %p280_p6 = pnand %p279_p5, %p273_p2 }
 0x103   :  { %v102_v10 = vpop.f32.mrb[0].mxu0  ;;  %v170_v11 = vpop.f32.mrb[0].mxu1 }
 0x104   :  { %109 = vst [vmem:[#allocation7] sm:$0xff] %v102_v10  ;;  %178 = vst [vmem:[#allocation7 + $0x10] sm:$0xff] %v170_v11  ;;  %v104_v12 = vpop.f32.mrb[1].mxu0  ;;  %v172_v13 = vpop.f32.mrb[1].mxu1 }
 0x105   :  { %110 = vst [vmem:[#allocation7 + $0x8] sm:$0xff] %v104_v12  ;;  %179 = vst [vmem:[#allocation7 + $0x18] sm:$0xff] %v172_v13  ;;  %v106_v14 = vpop.f32.mrb[2].mxu0  ;;  %v174_v15 = vpop.f32.mrb[2].mxu1 }
 0x106   :  { %v107_v16 = vpop.f32.mrb[3].mxu0  ;;  %v175_v17 = vpop.f32.mrb[3].mxu1 }
 0x107   :  { %283 = shalt.err (!%p280_p6)
}
 0x108   :  { %s284_s10 = scalar_lea.hbm %s375_s2, 512 }
 0x109   :  { %p285_p7 = scmp.ne.s32.totalorder %s375_s2, %s284_s10  ;;  %p288_p8 = scmp.lt.u32.totalorder %s284_s10, %s375_s2 }
 0x10b   :  { %p290_p9 = pnand %p288_p8, %p285_p7 }
 0x10d   :  { %293 = shalt.err (!%p290_p9)
}
 0x10e   :  { %s306_s15 = smov 256   ;;  %s307_s16 = smov 16  }
 0x10f   :  { %191 = dma.vmem_to_hbm [thread:$0]  %s354_s6, 512, %s375_s2, [#allocation4], %s306_s15, %s306_s15, %s307_s16  }
 0x110   :  { %298 = dma.done.wait [#allocation4], 512  }
 0x111   :  { %299 = vsyncadd [#allocation4], 4294966784 }
 0x112   :  { %195 = vsyncpa [#allocation3], 1 }
 0x113   :  { %196 = vsyncpa [#allocation6], 1 }
 0x114   :  { %197 = vsyncpa [#allocation4], 1 }

</bundles_post_ra>
